<compile_context>
chip_gen: v5e
topology: v5e:2x2
jax: 0.10.0
libtpu: 0.0.40
codegen_flags: <defaults>
</compile_context>

<pallas_src>
import jax
import jax.numpy as jnp
from jax import lax
from jax.experimental import pallas as pl
from jax.experimental.pallas import tpu as pltpu

_LANE = 128
_SUBLANE = 8
_ROW_ALIGN = 32                  # row-tile alignment when tiling rows (bf16/int8 friendly)
_TILE_BUDGET_ELEMS = 1 << 20     # ~1M elems (~4 MiB f32) per input plane per grid step
_MAX_TN_FIRST = 4096             # initial lane-tile cap before budget regrow
_VMEM_LIMIT_BYTES = 48 << 20     # explicit scoped-VMEM limit (safe on v5e/v6e/v7x)


def _round_up(x, m):
    return ((x + m - 1) // m) * m


def _round_down_at_least(x, m):
    return max(m, (x // m) * m)


def _tc_cores_per_device():
    """Best-effort count of TensorCores sharing one JAX device (megacore)."""
    try:
        kind = jax.devices()[0].device_kind.lower()
    except Exception:
        return 1
    if any(tag in kind for tag in ("v7", "tpu7", "7x", "v4")):
        return 2
    return 1


def _tile_sizes(B, N, block_rows=None, block_cols=None):
    tb_full = _round_up(B, _SUBLANE)
    tn_full = _round_up(N, _LANE)

    if block_cols is not None:
        tn = min(_round_up(block_cols, _LANE), tn_full)
    else:
        tn = min(tn_full, _MAX_TN_FIRST)

    if block_rows is not None:
        tb = min(_round_up(block_rows, _SUBLANE), tb_full)
    else:
        tb_cap = _round_down_at_least(_TILE_BUDGET_ELEMS // tn, _ROW_ALIGN)
        tb = min(tb_full, max(tb_cap, _SUBLANE))
        # Multi-TensorCore chips: make sure the "parallel" row axis has at
        # least two tiles so both cores (and their DMA issue slots) get work.
        if _tc_cores_per_device() >= 2 and B >= 4 * _SUBLANE:
            tb = min(tb, _round_up((B + 1) // 2, 2 * _SUBLANE))

    if block_cols is None:
        # Spend any remaining budget on wider column tiles (lane-dense DMA,
        # fewer grid steps).
        tn_cap = _round_down_at_least(_TILE_BUDGET_ELEMS // tb, _LANE)
        tn = min(tn_full, max(tn, tn_cap))

    return tb, tn


def _make_kernel(B, N, TB, TN):
    row_ragged = (B % TB) != 0
    col_ragged = (N % TN) != 0
    n_row_groups = TB // _SUBLANE

    def kernel(out_r_ref, out_i_ref, tgt_ref, partial_ref, acc_ref):
        j = pl.program_id(1)

        # (o_r - t_r) + (o_i - t_i) == (o_r + o_i) - (t_r + t_i).  Prediction
        # planes arrive in their source dtype and are cast here (free VPU
        # work); the target pair-sum arrives pre-fused as a single f32 plane.
        pred_sum = (
            out_r_ref[...].astype(jnp.float32) + out_i_ref[...].astype(jnp.float32)
        )
        diff = pred_sum - tgt_ref[...]
        sq = diff * diff

        # Mask only the dimensions that can actually be ragged, comparing the
        # local iota against the scalar remainder (all-true on interior tiles).
        if row_ragged or col_ragged:
            mask = None
            if row_ragged:
                rows_left = B - pl.program_id(0) * TB
                mask = lax.broadcasted_iota(jnp.int32, (TB, TN), 0) < rows_left
            if col_ragged:
                cols_left = N - j * TN
                cmask = lax.broadcasted_iota(jnp.int32, (TB, TN), 1) < cols_left
                mask = cmask if mask is None else (mask & cmask)
            sq = jnp.where(mask, sq, 0.0)

        # Full-tile f32 accumulator: pure element-wise VPU work every step,
        # no cross-lane/sublane reduce and no SMEM round trip on the hot path.
        @pl.when(j == 0)
        def _init():
            acc_ref[...] = sq

        @pl.when(j != 0)
        def _accumulate():
            acc_ref[...] += sq

        # Last column tile of this row tile: fold the accumulator down to one
        # lane-dense (8, TN) slab and emit it; the wrapper sums the partials.
        @pl.when(j == pl.num_programs(1) - 1)
        def _finalize():
            total = acc_ref[pl.ds(0, _SUBLANE), :]
            if n_row_groups > 1:
                def body(g, carry):
                    start = pl.multiple_of(g * _SUBLANE, _SUBLANE)
                    return carry + acc_ref[pl.ds(start, _SUBLANE), :]

                total = lax.fori_loop(1, n_row_groups, body, total)
            partial_ref[0] = total

    return kernel


def complex_loss(output_real, output_imag, target, *, block_rows=None, block_cols=None):
    """Pallas TPU implementation of ComplexLoss.forward.

    loss = mean((output_real - target[..., 0] + output_imag - target[..., -1]) ** 2)

    Args:
      output_real: (B, N) prediction of the real part (any float dtype).
      output_imag: (B, N) prediction of the imaginary part.
      target:      (B, N, C) labels; column 0 = real, column -1 = imaginary.
      block_rows/block_cols: optional tile-size overrides (testing/tuning).

    Returns:
      scalar float32 loss.
    """
    assert output_real.shape == output_imag.shape
    assert target.ndim == 3 and target.shape[:2] == output_real.shape
    B, N = output_real.shape

    # Single fused XLA pass: pre-sum the two (lane-interleaved) target columns
    # into one dense f32 plane.  (See module-level TODO about feeding the raw
    # interleaved target directly.)
    tgt_sum = target[..., 0].astype(jnp.float32) + target[..., -1].astype(jnp.float32)

    TB, TN = _tile_sizes(B, N, block_rows=block_rows, block_cols=block_cols)
    GB = pl.cdiv(B, TB)
    GN = pl.cdiv(N, TN)

    in_spec = pl.BlockSpec((TB, TN), lambda i, j: (i, j))
    in_bytes = B * N * (
        output_real.dtype.itemsize
        + output_imag.dtype.itemsize
        + tgt_sum.dtype.itemsize
    )
    out_bytes = GB * _SUBLANE * TN * 4

    partials = pl.pallas_call(
        _make_kernel(B, N, TB, TN),
        out_shape=jax.ShapeDtypeStruct((GB, _SUBLANE, TN), jnp.float32),
        grid_spec=pltpu.PrefetchScalarGridSpec(
            num_scalar_prefetch=0,
            grid=(GB, GN),
            in_specs=[in_spec, in_spec, in_spec],
            out_specs=pl.BlockSpec((1, _SUBLANE, TN), lambda i, j: (i, 0, 0)),
            scratch_shapes=[pltpu.VMEM((TB, TN), jnp.float32)],
        ),
        compiler_params=pltpu.CompilerParams(
            dimension_semantics=("parallel", "arbitrary"),
            vmem_limit_bytes=_VMEM_LIMIT_BYTES,
        ),
        cost_estimate=pl.CostEstimate(
            flops=4 * B * N,
            transcendentals=0,
            bytes_accessed=in_bytes + out_bytes,
        ),
    )(output_real, output_imag, tgt_sum)

    # Tiny final reduction; divide by B*N exactly once.
    return jnp.sum(partials) / (B * N)


if __name__ == "__main__":
    key = jax.random.PRNGKey(0)
    k1, k2, k3 = jax.random.split(key, 3)

    # Small shapes consistent with the module: batch=2, seq=8, 2 label columns.
    B, N = 2, 8
    output_real = jax.random.normal(k1, (B, N), dtype=jnp.float32)
    output_imag = jax.random.normal(k2, (B, N), dtype=jnp.float32)
    target = jax.random.normal(k3, (B, N, 2), dtype=jnp.float32)

    loss_fn = jax.jit(complex_loss)
    loss = jax.block_until_ready(loss_fn(output_real, output_imag, target))

    ref = jnp.mean(
        (output_real - target[:, :, 0] + (output_imag - target[:, :, -1])) ** 2
    )
    assert jnp.allclose(loss, ref, rtol=1e-6, atol=1e-6), (loss, ref)

    # Larger, ragged shapes (default tiling).
    kk1, kk2, kk3 = jax.random.split(jax.random.PRNGKey(1), 3)
    B2, N2 = 40, 3000
    o_r2 = jax.random.normal(kk1, (B2, N2), dtype=jnp.float32)
    o_i2 = jax.random.normal(kk2, (B2, N2), dtype=jnp.float32)
    tgt2 = jax.random.normal(kk3, (B2, N2, 2), dtype=jnp.float32)
    loss2 = jax.block_until_ready(loss_fn(o_r2, o_i2, tgt2))
    ref2 = jnp.mean((o_r2 - tgt2[:, :, 0] + (o_i2 - tgt2[:, :, -1])) ** 2)
    assert jnp.allclose(loss2, ref2, rtol=1e-5, atol=1e-6), (loss2, ref2)

    # Force a multi-tile grid on both axes to exercise the column-accumulate,
    # multi-row-tile and edge-masking paths.
    small_tile_fn = jax.jit(
        lambda a, b, c: complex_loss(a, b, c, block_rows=16, block_cols=512)
    )
    loss3 = jax.block_until_ready(small_tile_fn(o_r2, o_i2, tgt2))
    assert jnp.allclose(loss3, ref2, rtol=1e-5, atol=1e-6), (loss3, ref2)

    print("KERNEL_OK")
</pallas_src>

<mosaic_0001>
module attributes {stable_mosaic.version = 11 : i64} {
  func.func @kernel(%arg0: i32, %arg1: i32, %arg2: memref<8x128xf32, #tpu.memory_space<vmem>>, %arg3: memref<8x128xf32, #tpu.memory_space<vmem>>, %arg4: memref<8x128xf32, #tpu.memory_space<vmem>>, %arg5: memref<1x8x128xf32, #tpu.memory_space<vmem>>, %arg6: memref<8x128xf32, #tpu.memory_space<vmem>>) attributes {dimension_semantics = [#tpu.dimension_semantics<parallel>, #tpu.dimension_semantics<arbitrary>], iteration_bounds = array<i64: 1, 1>, scalar_prefetch = 0 : i64, scratch_operands = 1 : i64, tpu.core_type = #tpu.core_type<tc>, window_params = [{transform_indices = @transform_0, window_bounds = array<i64: 8, 128>}, {transform_indices = @transform_1, window_bounds = array<i64: 8, 128>}, {transform_indices = @transform_2, window_bounds = array<i64: 8, 128>}, {transform_indices = @transform_3, window_bounds = array<i64: 1, 8, 128>}]} {
    %c0 = arith.constant 0 : index
    %c0_0 = arith.constant 0 : index
    %0 = vector.load %arg2[%c0, %c0_0] : memref<8x128xf32, #tpu.memory_space<vmem>>, vector<8x128xf32>
    %c0_1 = arith.constant 0 : index
    %c0_2 = arith.constant 0 : index
    %1 = vector.load %arg3[%c0_1, %c0_2] : memref<8x128xf32, #tpu.memory_space<vmem>>, vector<8x128xf32>
    %2 = arith.addf %0, %1 : vector<8x128xf32>
    %c0_3 = arith.constant 0 : index
    %c0_4 = arith.constant 0 : index
    %3 = vector.load %arg4[%c0_3, %c0_4] : memref<8x128xf32, #tpu.memory_space<vmem>>, vector<8x128xf32>
    %4 = arith.subf %2, %3 : vector<8x128xf32>
    %5 = arith.mulf %4, %4 : vector<8x128xf32>
    %c8_i32 = arith.constant 8 : i32
    %6 = arith.muli %arg0, %c8_i32 : i32
    %c2_i32 = arith.constant 2 : i32
    %7 = arith.subi %c2_i32, %6 : i32
    %8 = tpu.iota {dimensions = array<i32: 0>} : vector<8x128xi32>
    %9 = vector.broadcast %7 : i32 to vector<8x128xi32>
    %10 = arith.cmpi slt, %8, %9 : vector<8x128xi32>
    %c128_i32 = arith.constant 128 : i32
    %11 = arith.muli %arg1, %c128_i32 : i32
    %c8_i32_5 = arith.constant 8 : i32
    %12 = arith.subi %c8_i32_5, %11 : i32
    %13 = tpu.iota {dimensions = array<i32: 1>} : vector<8x128xi32>
    %14 = vector.broadcast %12 : i32 to vector<8x128xi32>
    %15 = arith.cmpi slt, %13, %14 : vector<8x128xi32>
    %16 = arith.andi %10, %15 : vector<8x128xi1>
    %cst = arith.constant 0.000000e+00 : f32
    %17 = vector.broadcast %cst : f32 to vector<8x128xf32>
    %18 = arith.select %16, %5, %17 : vector<8x128xi1>, vector<8x128xf32>
    %c0_i32 = arith.constant 0 : i32
    %19 = arith.cmpi eq, %arg1, %c0_i32 : i32
    %20 = arith.extui %19 : i1 to i32
    %c0_i32_6 = arith.constant 0 : i32
    %21 = arith.cmpi ne, %20, %c0_i32_6 : i32
    scf.if %21 {
      %c0_11 = arith.constant 0 : index
      %c0_12 = arith.constant 0 : index
      %28 = vector.load %arg6[%c0_11, %c0_12] : memref<8x128xf32, #tpu.memory_space<vmem>>, vector<8x128xf32>
      tpu.vector_store %arg6[%c0_11, %c0_12], %18 {strides = array<i32>} : memref<8x128xf32, #tpu.memory_space<vmem>>, vector<8x128xf32>,
    } else {
    }
    %c0_i32_7 = arith.constant 0 : i32
    %22 = arith.cmpi ne, %arg1, %c0_i32_7 : i32
    %23 = arith.extui %22 : i1 to i32
    %c0_i32_8 = arith.constant 0 : i32
    %24 = arith.cmpi ne, %23, %c0_i32_8 : i32
    scf.if %24 {
      %c0_11 = arith.constant 0 : index
      %c0_12 = arith.constant 0 : index
      %28 = vector.load %arg6[%c0_11, %c0_12] : memref<8x128xf32, #tpu.memory_space<vmem>>, vector<8x128xf32>
      %29 = arith.addf %28, %18 : vector<8x128xf32>
      %c0_13 = arith.constant 0 : index
      %c0_14 = arith.constant 0 : index
      %30 = vector.load %arg6[%c0_13, %c0_14] : memref<8x128xf32, #tpu.memory_space<vmem>>, vector<8x128xf32>
      tpu.vector_store %arg6[%c0_13, %c0_14], %29 {strides = array<i32>} : memref<8x128xf32, #tpu.memory_space<vmem>>, vector<8x128xf32>,
    } else {
    }
    %c0_i32_9 = arith.constant 0 : i32
    %25 = arith.cmpi eq, %arg1, %c0_i32_9 : i32
    %26 = arith.extui %25 : i1 to i32
    %c0_i32_10 = arith.constant 0 : i32
    %27 = arith.cmpi ne, %26, %c0_i32_10 : i32
    scf.if %27 {
      %c0_11 = arith.constant 0 : index
      %c0_12 = arith.constant 0 : index
      %28 = vector.load %arg6[%c0_11, %c0_12] : memref<8x128xf32, #tpu.memory_space<vmem>>, vector<8x128xf32>
      %c0_13 = arith.constant 0 : index
      %c0_14 = arith.constant 0 : index
      %c0_15 = arith.constant 0 : index
      %29 = vector.load %arg5[%c0_13, %c0_14, %c0_15] : memref<1x8x128xf32, #tpu.memory_space<vmem>>, vector<1x8x128xf32>
      %30 = vector.shape_cast %29 : vector<1x8x128xf32> to vector<8x128xf32>
      %31 = vector.shape_cast %28 : vector<8x128xf32> to vector<1x8x128xf32>
      tpu.vector_store %arg5[%c0_13, %c0_14, %c0_15], %31 {strides = array<i32>} : memref<1x8x128xf32, #tpu.memory_space<vmem>>, vector<1x8x128xf32>,
    } else {
    }
    return
  }
  func.func @transform_0(%arg0: i32, %arg1: i32) -> (i32, i32) {
    %c0_i32 = arith.constant 0 : i32
    return %arg0, %arg1 : i32, i32
  }
  func.func @transform_1(%arg0: i32, %arg1: i32) -> (i32, i32) {
    %c0_i32 = arith.constant 0 : i32
    return %arg0, %arg1 : i32, i32
  }
  func.func @transform_2(%arg0: i32, %arg1: i32) -> (i32, i32) {
    %c0_i32 = arith.constant 0 : i32
    return %arg0, %arg1 : i32, i32
  }
  func.func @transform_3(%arg0: i32, %arg1: i32) -> (i32, i32, i32) {
    %c0_i32 = arith.constant 0 : i32
    %c0_i32_0 = arith.constant 0 : i32
    %c0_i32_1 = arith.constant 0 : i32
    return %arg0, %c0_i32, %c0_i32_0 : i32, i32, i32
  }
}

</mosaic_0001>

<bundles_post_ra>
// kernel: complex_loss.1
= control target key start
LH: loop header
LB: loop body
LE: loop exit
PB: predicated region body
PF: predicated region fallthrough
CT: control target
= control target key end

     0   :  { %v22_v0 = vlaneseq  ;;  %s87_s0 = inlined_call_operand.vmem [shape: f32[2,8], index: 0, kind: input, shape index: {}]   ;;  %s88_s1 = inlined_call_operand.vmem [shape: f32[2,8], index: 1, kind: input, shape index: {}]   ;;  %s89_s2 = inlined_call_operand.vmem [shape: f32[2,8], index: 2, kind: input, shape index: {}]   ;;  %s90_s3 = inlined_call_operand.vmem [shape: f32[1,8,128], index: 3, kind: output, shape index: {}]  }
   0x1   :  { %v14_v1 = vld [vmem:[%s87_s0] sm:$0xff] }
   0x2   :  { %v15_v2 = vld [vmem:[%s88_s1] sm:$0xff]  ;;  %v23_v5 = vshrl.u32 %v22_v0, 7  ;;  %v29_v6 = vand.u32 127, %v22_v0 }
   0x3   :  { %v17_v3 = vld [vmem:[%s89_s2] sm:$0xff]  ;;  %v16_v4 = vadd.f32 %v15_v2, %v14_v1 }
   0x4   :  { %vm25_vm0 = vcmp.lt.s32.totalorder %v23_v5, 2  ;;  %vm31_vm1 = vcmp.lt.s32.totalorder %v29_v6, 8 }
   0x5   :  { %v18_v7 = vsub.f32 %v16_v4, %v17_v3  ;;  %vm32_vm2 = vmand %vm25_vm0, %vm31_vm1 }
   0x7   :  { %v19_v8 = vmul.f32 %v18_v7, %v18_v7 }
   0x9   :  { %v33_v9 = vsel %vm32_vm2, %v19_v8, 0.0 }
   0xa   :  { %50 = vst [vmem:[%s90_s3] sm:$0xff] %v33_v9 }

</bundles_post_ra>
